<compile_context>
chip_gen: v7x
topology: tpu7x:2x2x1
jax: 0.10.0
libtpu: 0.0.40
codegen_flags: <defaults>
</compile_context>

<pallas_src>
import functools

import jax
import jax.numpy as jnp
from jax import lax
from jax.experimental import pallas as pl
from jax.experimental.pallas import tpu as pltpu

S_SUB_MAX = 64        # rows per Hillis-Steele scan sub-chunk (log2 depth = 6)
SUB_PER_STEP = 4      # sub-chunks processed per grid step (amortizes grid/DMA overhead)
W_SLAB_BUDGET = 16 * 1024 * 1024   # per-tile weight slab budget (v7x 64 MiB VMEM safe)


def _round_up(n, m):
    return (n + m - 1) // m * m


def _softplus(z):
    # stable log(1 + exp(z)) without logaddexp's extra inf-handling selects
    return jnp.maximum(z, 0.0) + jnp.log1p(jnp.exp(-jnp.abs(z)))


def _choose_d_blk(d_inner, d_in):
    """Widest feature tile (multiple of 128) dividing the padded feature dim within budget."""
    d_pad = _round_up(d_inner, 128)
    for cand in (512, 256, 128):
        # 2 buffers x (d_in, 3*cand) bf16 weight slab must stay within the VMEM budget.
        if d_pad % cand == 0 and d_in * 3 * cand * 2 * 2 <= W_SLAB_BUDGET:
            return cand, d_pad
    return 128, d_pad


def pack_weight(weight):
    """One-time re-layout of the PyTorch Linear weight (3*dim_inner, dim).

    Returns (n_d, D_in, 3*d_blk) bf16: per feature tile a contiguous [hidden | f | i] slab
    in x @ w layout, so the kernel does a single fused MXU matmul per sub-chunk.
    Hoisted out of the per-call path (weights are static for inference).
    """
    three_d_inner, d_in = weight.shape
    d_inner = three_d_inner // 3
    d_blk, d_pad = _choose_d_blk(d_inner, d_in)
    n_d = d_pad // d_blk
    w3 = weight.reshape(3, d_inner, d_in)                       # (gate, out, in)
    w3 = jnp.pad(w3, ((0, 0), (0, d_pad - d_inner), (0, 0)))    # zero-pad feature dim
    w_cat = (w3.reshape(3, n_d, d_blk, d_in)
               .transpose(1, 3, 0, 2)                           # (d, in, gate, lane)
               .reshape(n_d, d_in, 3 * d_blk)
               .astype(jnp.bfloat16))                           # bf16 MXU operand
    return w_cat


def minlstm_kernel(x_ref, w_ref, o_ref, c_ref, *, s_sub, n_sub):
    # x_ref : (s_blk, D_in)      bf16 input rows of this sequence chunk (s_blk = n_sub*s_sub)
    # w_ref : (D_in, 3*d_blk)    bf16 weights [hidden | f_gate | i_gate] for this feature tile
    # o_ref : (s_blk, d_blk)     output rows (lane-dense, multiple of 128 wide)
    # c_ref : (1, d_blk) f32     rebased carry = log(h) at the last previous row (-inf at t=0)
    s_idx = pl.program_id(2)
    d_blk = o_ref.shape[-1]

    @pl.when(s_idx == 0)
    def _():
        c_ref[...] = jnp.full(c_ref.shape, -jnp.inf, c_ref.dtype)

    w = w_ref[...]
    c_prev = c_ref[...]                                     # (1, d_blk)
    row = lax.broadcasted_iota(jnp.int32, (s_sub, d_blk), 0)

    # Unrolled inner loop over sub-chunks: big x DMA per grid step, bounded vreg pressure
    # and log2(s_sub)-deep EUP scans per sub-chunk, serial only through the (1, d_blk) carry.
    for k in range(n_sub):
        x_sub = x_ref[k * s_sub:(k + 1) * s_sub, :]          # static slice -> free
        # fused gate projection: one bf16 MXU matmul, f32 accumulation
        proj = jnp.dot(x_sub, w, preferred_element_type=jnp.float32)   # (s_sub, 3*d_blk)
        hidden = proj[:, :d_blk]
        f_gate = proj[:, d_blk:2 * d_blk]
        i_gate = proj[:, 2 * d_blk:]

        # ---- log-space gates (seq_len > 1 branch), f32 VPU/EUP math ----
        diff = _softplus(-f_gate) - _softplus(-i_gate)
        sp_diff = _softplus(diff)
        log_f = -sp_diff                                     # = -softplus(diff)
        log_i = diff - sp_diff                               # = -softplus(-diff)
        # log_g folded: log(where(h>=0, h+0.5, sigmoid(h))); sigmoid via tanh (1 EUP op),
        # tiny floor guards the tanh saturation tail (log of exact 0).
        sig = 0.5 * jnp.tanh(0.5 * hidden) + 0.5
        log_h = jnp.log(jnp.where(hidden >= 0.0, hidden + 0.5, jnp.maximum(sig, 1e-38)))
        log_v = log_i + log_h                                # log_values

        # ---- within-sub-chunk inclusive cumsum of log_f (Hillis-Steele, XLU roll + VPU) ----
        ca = log_f
        shift = 1
        while shift < s_sub:
            rolled = pltpu.roll(ca, shift=shift, axis=0)
            ca = ca + jnp.where(row >= shift, rolled, 0.0)
            shift *= 2

        # ---- within-sub-chunk inclusive logcumsumexp of (log_v - ca) (EUP-bound) ----
        r = log_v - ca
        shift = 1
        while shift < s_sub:
            rolled = pltpu.roll(r, shift=shift, axis=0)
            r = jnp.logaddexp(r, jnp.where(row >= shift, rolled, -jnp.inf))
            shift *= 2

        # ---- combine with the rebased carry and store one lane-dense sub-tile ----
        log_out = ca + jnp.logaddexp(c_prev, r)              # log h_t for these rows
        o_ref[k * s_sub:(k + 1) * s_sub, :] = jnp.exp(log_out).astype(o_ref.dtype)
        c_prev = log_out[s_sub - 1:, :]                      # carry = log h at last row

    c_ref[...] = c_prev


@functools.partial(jax.jit, static_argnames=("d_inner",))
def minlstm_forward_packed(x, w_cat, d_inner):
    """x: (B, S, dim) ; w_cat: packed weights from pack_weight ; d_inner: true feature dim."""
    B, S, D_in = x.shape
    n_d, d_in_w, three_d_blk = w_cat.shape
    assert d_in_w == D_in
    d_blk = three_d_blk // 3
    d_pad = n_d * d_blk

    if S < 2:
        # TODO(synk): seq_len == 1 sigmoid-gate path not implemented.
        raise NotImplementedError("minlstm_forward_packed only implements the seq_len > 1 path")

    # Sequence tiling: sub-chunks of <=64 rows (multiple of 16 for bf16 sublanes), up to
    # SUB_PER_STEP sub-chunks per grid step. Padded tail rows are causal garbage that never
    # affects real outputs (sliced off below).
    s_sub = min(S_SUB_MAX, _round_up(S, 16))
    n_sub = max(1, min(SUB_PER_STEP, pl.cdiv(S, s_sub)))
    s_blk = s_sub * n_sub
    S_pad = _round_up(S, s_blk)
    n_s = S_pad // s_blk

    # bf16 x on the wrapper side (half the DMA bytes); pad only if needed.
    x_bf = x.astype(jnp.bfloat16)
    if S_pad != S:
        x_bf = jnp.pad(x_bf, ((0, 0), (0, S_pad - S), (0, 0)))

    kernel = functools.partial(minlstm_kernel, s_sub=s_sub, n_sub=n_sub)

    out = pl.pallas_call(
        kernel,
        out_shape=jax.ShapeDtypeStruct((B, S_pad, d_pad), x.dtype),
        grid_spec=pltpu.PrefetchScalarGridSpec(
            num_scalar_prefetch=0,
            grid=(B, n_d, n_s),        # (parallel, parallel, arbitrary-seq) — B*n_d megacore work
            in_specs=[
                pl.BlockSpec((None, s_blk, D_in), lambda b, d, s: (b, s, 0)),
                pl.BlockSpec((None, D_in, 3 * d_blk), lambda b, d, s: (d, 0, 0)),
            ],
            out_specs=pl.BlockSpec((None, s_blk, d_blk), lambda b, d, s: (b, s, d)),
            scratch_shapes=[pltpu.VMEM((1, d_blk), jnp.float32)],   # rebased carry
        ),
        compiler_params=pltpu.CompilerParams(
            dimension_semantics=("parallel", "parallel", "arbitrary"),
            vmem_limit_bytes=48 * 1024 * 1024),   # headroom above defaults, v7x-safe
    )(x_bf, w_cat)

    if S_pad != S or d_pad != d_inner:
        out = out[:, :S, :d_inner]
    return out


def minlstm_forward(x, weight):
    """Convenience wrapper: packs the weight (prefer pack_weight() once for static weights)."""
    d_inner = weight.shape[0] // 3
    return minlstm_forward_packed(x, pack_weight(weight), d_inner)


def minlstm_reference(x, weight):
    """Pure-JAX reference of the PyTorch forward (seq_len>1, no prev_hidden, Identity out).

    Gate/scan math follows the PyTorch formulas exactly; the matmul uses bf16 operands with
    f32 accumulation to mirror the kernel's MXU precision.
    """
    d_inner = weight.shape[0] // 3
    proj = jnp.einsum("bsd,ed->bse", x.astype(jnp.bfloat16), weight.astype(jnp.bfloat16),
                      preferred_element_type=jnp.float32)
    hidden = proj[..., :d_inner]
    f_gate = proj[..., d_inner:2 * d_inner]
    i_gate = proj[..., 2 * d_inner:]

    sp = lambda z: jnp.logaddexp(z, 0.0)
    diff = sp(-f_gate) - sp(-i_gate)
    log_f = -sp(diff)
    log_i = -sp(-diff)
    log_tilde_h = jnp.where(hidden >= 0.0,
                            jnp.log(jnp.maximum(hidden, 0.0) + 0.5),
                            -sp(-hidden))
    log_values = log_i + log_tilde_h

    a_star = jnp.cumsum(log_f, axis=1)
    lcse = lax.cumlogsumexp(log_values - a_star, axis=1)
    return jnp.exp(a_star + lcse)


if __name__ == "__main__":
    # minLSTM(dim=32, expansion_factor=1.0) -> dim_inner=32, to_out = Identity
    B, S, DIM = 2, 8, 32
    DIM_INNER = DIM

    key = jax.random.PRNGKey(0)
    kx, kw = jax.random.split(key)
    x = jax.random.normal(kx, (B, S, DIM), dtype=jnp.float32)
    # PyTorch Linear(dim, 3*dim_inner, bias=False) init: U(-1/sqrt(dim), 1/sqrt(dim))
    bound = 1.0 / (DIM ** 0.5)
    weight = jax.random.uniform(kw, (3 * DIM_INNER, DIM), dtype=jnp.float32,
                                minval=-bound, maxval=bound)

    w_cat = pack_weight(weight)   # hoisted one-time weight re-layout (static for inference)
    out = jax.block_until_ready(minlstm_forward_packed(x, w_cat, DIM_INNER))
    ref = jax.block_until_ready(minlstm_reference(x, weight))

    assert out.shape == (B, S, DIM_INNER)
    max_err = float(jnp.max(jnp.abs(out - ref)))
    assert jnp.allclose(out, ref, rtol=5e-3, atol=5e-3), (
        f"mismatch: max abs err = {max_err}")

    print("KERNEL_OK")
</pallas_src>

<mosaic_0001>
module attributes {stable_mosaic.version = 11 : i64} {
  func.func @minlstm_kernel(%arg0: i32, %arg1: i32, %arg2: i32, %arg3: memref<1x16x32xbf16, #tpu.memory_space<vmem>>, %arg4: memref<1x32x384xbf16, #tpu.memory_space<vmem>>, %arg5: memref<1x16x128xf32, #tpu.memory_space<vmem>>, %arg6: memref<1x128xf32, #tpu.memory_space<vmem>>) attributes {dimension_semantics = [#tpu.dimension_semantics<parallel>, #tpu.dimension_semantics<parallel>, #tpu.dimension_semantics<arbitrary>], iteration_bounds = array<i64: 2, 1, 1>, scalar_prefetch = 0 : i64, scratch_operands = 1 : i64, tpu.core_type = #tpu.core_type<tc>, window_params = [{transform_indices = @transform_0, window_bounds = array<i64: 1, 16, 32>}, {transform_indices = @transform_1, window_bounds = array<i64: 1, 32, 384>}, {transform_indices = @transform_2, window_bounds = array<i64: 1, 16, 128>}]} {
    %c0_i32 = arith.constant 0 : i32
    %0 = arith.cmpi eq, %arg2, %c0_i32 : i32
    %1 = arith.extui %0 : i1 to i32
    %c0_i32_0 = arith.constant 0 : i32
    %2 = arith.cmpi ne, %1, %c0_i32_0 : i32
    scf.if %2 {
      %cst_53 = arith.constant 0xFF800000 : f32
      %171 = vector.broadcast %cst_53 : f32 to vector<1x128xf32>
      %c0_54 = arith.constant 0 : index
      %c0_55 = arith.constant 0 : index
      %172 = vector.load %arg6[%c0_54, %c0_55] : memref<1x128xf32, #tpu.memory_space<vmem>>, vector<1x128xf32>
      tpu.vector_store %arg6[%c0_54, %c0_55], %171 {strides = array<i32>} : memref<1x128xf32, #tpu.memory_space<vmem>>, vector<1x128xf32>,
    } else {
    }
    %c0 = arith.constant 0 : index
    %c0_1 = arith.constant 0 : index
    %c0_2 = arith.constant 0 : index
    %3 = vector.load %arg4[%c0, %c0_1, %c0_2] : memref<1x32x384xbf16, #tpu.memory_space<vmem>>, vector<1x32x384xbf16>
    %4 = vector.shape_cast %3 : vector<1x32x384xbf16> to vector<32x384xbf16>
    %c0_3 = arith.constant 0 : index
    %c0_4 = arith.constant 0 : index
    %5 = vector.load %arg6[%c0_3, %c0_4] : memref<1x128xf32, #tpu.memory_space<vmem>>, vector<1x128xf32>
    %6 = tpu.iota {dimensions = array<i32: 0>} : vector<16x128xi32>
    %c0_5 = arith.constant 0 : index
    %c0_6 = arith.constant 0 : index
    %c0_7 = arith.constant 0 : index
    %7 = vector.load %arg3[%c0_5, %c0_6, %c0_7] : memref<1x16x32xbf16, #tpu.memory_space<vmem>>, vector<1x16x32xbf16>
    %8 = vector.shape_cast %7 : vector<1x16x32xbf16> to vector<16x32xbf16>
    %cst = arith.constant dense<0.000000e+00> : vector<16x384xf32>
    %9 = tpu.matmul %8, %4, %cst {dimension_numbers = #tpu.dot_dimension_numbers<[1], [0], [0], [1], [0, 0, 1, 1], [], []>} : vector<16x32xbf16>, vector<32x384xbf16>, vector<16x384xf32> -> vector<16x384xf32>
    %10 = vector.extract_strided_slice %9 {offsets = [0, 0], sizes = [16, 128], strides = [1, 1]} : vector<16x384xf32> to vector<16x128xf32>
    %11 = vector.extract_strided_slice %9 {offsets = [0, 128], sizes = [16, 128], strides = [1, 1]} : vector<16x384xf32> to vector<16x128xf32>
    %12 = vector.extract_strided_slice %9 {offsets = [0, 256], sizes = [16, 128], strides = [1, 1]} : vector<16x384xf32> to vector<16x128xf32>
    %cst_8 = arith.constant 0.000000e+00 : f32
    %13 = vector.broadcast %cst_8 : f32 to vector<16x128xf32>
    %14 = arith.subf %13, %11 : vector<16x128xf32>
    %cst_9 = arith.constant 0.000000e+00 : f32
    %15 = vector.broadcast %cst_9 : f32 to vector<16x128xf32>
    %16 = arith.maximumf %14, %15 : vector<16x128xf32>
    %17 = math.absf %14 : vector<16x128xf32>
    %cst_10 = arith.constant 0.000000e+00 : f32
    %18 = vector.broadcast %cst_10 : f32 to vector<16x128xf32>
    %19 = arith.subf %18, %17 : vector<16x128xf32>
    %20 = math.exp %19 : vector<16x128xf32>
    %21 = math.log1p %20 : vector<16x128xf32>
    %22 = arith.addf %16, %21 : vector<16x128xf32>
    %cst_11 = arith.constant 0.000000e+00 : f32
    %23 = vector.broadcast %cst_11 : f32 to vector<16x128xf32>
    %24 = arith.subf %23, %12 : vector<16x128xf32>
    %cst_12 = arith.constant 0.000000e+00 : f32
    %25 = vector.broadcast %cst_12 : f32 to vector<16x128xf32>
    %26 = arith.maximumf %24, %25 : vector<16x128xf32>
    %27 = math.absf %24 : vector<16x128xf32>
    %cst_13 = arith.constant 0.000000e+00 : f32
    %28 = vector.broadcast %cst_13 : f32 to vector<16x128xf32>
    %29 = arith.subf %28, %27 : vector<16x128xf32>
    %30 = math.exp %29 : vector<16x128xf32>
    %31 = math.log1p %30 : vector<16x128xf32>
    %32 = arith.addf %26, %31 : vector<16x128xf32>
    %33 = arith.subf %22, %32 : vector<16x128xf32>
    %cst_14 = arith.constant 0.000000e+00 : f32
    %34 = vector.broadcast %cst_14 : f32 to vector<16x128xf32>
    %35 = arith.maximumf %33, %34 : vector<16x128xf32>
    %36 = math.absf %33 : vector<16x128xf32>
    %cst_15 = arith.constant 0.000000e+00 : f32
    %37 = vector.broadcast %cst_15 : f32 to vector<16x128xf32>
    %38 = arith.subf %37, %36 : vector<16x128xf32>
    %39 = math.exp %38 : vector<16x128xf32>
    %40 = math.log1p %39 : vector<16x128xf32>
    %41 = arith.addf %35, %40 : vector<16x128xf32>
    %cst_16 = arith.constant 0.000000e+00 : f32
    %42 = vector.broadcast %cst_16 : f32 to vector<16x128xf32>
    %43 = arith.subf %42, %41 : vector<16x128xf32>
    %44 = arith.subf %33, %41 : vector<16x128xf32>
    %cst_17 = arith.constant 5.000000e-01 : f32
    %45 = vector.broadcast %cst_17 : f32 to vector<16x128xf32>
    %46 = arith.mulf %45, %10 : vector<16x128xf32>
    %47 = math.tanh %46 : vector<16x128xf32>
    %cst_18 = arith.constant 5.000000e-01 : f32
    %48 = vector.broadcast %cst_18 : f32 to vector<16x128xf32>
    %49 = arith.mulf %48, %47 : vector<16x128xf32>
    %cst_19 = arith.constant 5.000000e-01 : f32
    %50 = vector.broadcast %cst_19 : f32 to vector<16x128xf32>
    %51 = arith.addf %49, %50 : vector<16x128xf32>
    %cst_20 = arith.constant 0.000000e+00 : f32
    %52 = vector.broadcast %cst_20 : f32 to vector<16x128xf32>
    %53 = arith.cmpf oge, %10, %52 : vector<16x128xf32>
    %cst_21 = arith.constant 5.000000e-01 : f32
    %54 = vector.broadcast %cst_21 : f32 to vector<16x128xf32>
    %55 = arith.addf %10, %54 : vector<16x128xf32>
    %cst_22 = arith.constant 9.99999935E-39 : f32
    %56 = vector.broadcast %cst_22 : f32 to vector<16x128xf32>
    %57 = arith.maximumf %51, %56 : vector<16x128xf32>
    %58 = arith.select %53, %55, %57 : vector<16x128xi1>, vector<16x128xf32>
    %59 = math.log %58 : vector<16x128xf32>
    %60 = arith.addf %44, %59 : vector<16x128xf32>
    %c1_i32 = arith.constant 1 : i32
    %61 = tpu.dynamic_rotate %43 by %c1_i32 dim 0 : vector<16x128xf32>, i32 -> vector<16x128xf32>
    %c1_i32_23 = arith.constant 1 : i32
    %62 = vector.broadcast %c1_i32_23 : i32 to vector<16x128xi32>
    %63 = arith.cmpi sge, %6, %62 : vector<16x128xi32>
    %cst_24 = arith.constant 0.000000e+00 : f32
    %64 = vector.broadcast %cst_24 : f32 to vector<16x128xf32>
    %65 = arith.select %63, %61, %64 : vector<16x128xi1>, vector<16x128xf32>
    %66 = arith.addf %43, %65 : vector<16x128xf32>
    %c2_i32 = arith.constant 2 : i32
    %67 = tpu.dynamic_rotate %66 by %c2_i32 dim 0 : vector<16x128xf32>, i32 -> vector<16x128xf32>
    %c2_i32_25 = arith.constant 2 : i32
    %68 = vector.broadcast %c2_i32_25 : i32 to vector<16x128xi32>
    %69 = arith.cmpi sge, %6, %68 : vector<16x128xi32>
    %cst_26 = arith.constant 0.000000e+00 : f32
    %70 = vector.broadcast %cst_26 : f32 to vector<16x128xf32>
    %71 = arith.select %69, %67, %70 : vector<16x128xi1>, vector<16x128xf32>
    %72 = arith.addf %66, %71 : vector<16x128xf32>
    %c4_i32 = arith.constant 4 : i32
    %73 = tpu.dynamic_rotate %72 by %c4_i32 dim 0 : vector<16x128xf32>, i32 -> vector<16x128xf32>
    %c4_i32_27 = arith.constant 4 : i32
    %74 = vector.broadcast %c4_i32_27 : i32 to vector<16x128xi32>
    %75 = arith.cmpi sge, %6, %74 : vector<16x128xi32>
    %cst_28 = arith.constant 0.000000e+00 : f32
    %76 = vector.broadcast %cst_28 : f32 to vector<16x128xf32>
    %77 = arith.select %75, %73, %76 : vector<16x128xi1>, vector<16x128xf32>
    %78 = arith.addf %72, %77 : vector<16x128xf32>
    %c8_i32 = arith.constant 8 : i32
    %79 = tpu.dynamic_rotate %78 by %c8_i32 dim 0 : vector<16x128xf32>, i32 -> vector<16x128xf32>
    %c8_i32_29 = arith.constant 8 : i32
    %80 = vector.broadcast %c8_i32_29 : i32 to vector<16x128xi32>
    %81 = arith.cmpi sge, %6, %80 : vector<16x128xi32>
    %cst_30 = arith.constant 0.000000e+00 : f32
    %82 = vector.broadcast %cst_30 : f32 to vector<16x128xf32>
    %83 = arith.select %81, %79, %82 : vector<16x128xi1>, vector<16x128xf32>
    %84 = arith.addf %78, %83 : vector<16x128xf32>
    %85 = arith.subf %60, %84 : vector<16x128xf32>
    %c1_i32_31 = arith.constant 1 : i32
    %86 = tpu.dynamic_rotate %85 by %c1_i32_31 dim 0 : vector<16x128xf32>, i32 -> vector<16x128xf32>
    %c1_i32_32 = arith.constant 1 : i32
    %87 = vector.broadcast %c1_i32_32 : i32 to vector<16x128xi32>
    %88 = arith.cmpi sge, %6, %87 : vector<16x128xi32>
    %cst_33 = arith.constant 0xFF800000 : f32
    %89 = vector.broadcast %cst_33 : f32 to vector<16x128xf32>
    %90 = arith.select %88, %86, %89 : vector<16x128xi1>, vector<16x128xf32>
    %91 = arith.maximumf %85, %90 : vector<16x128xf32>
    %92 = arith.subf %85, %90 : vector<16x128xf32>
    %93 = arith.cmpf one, %92, %92 : vector<16x128xf32>
    %94 = arith.addf %85, %90 : vector<16x128xf32>
    %95 = math.absf %92 : vector<16x128xf32>
    %cst_34 = arith.constant 0.000000e+00 : f32
    %96 = vector.broadcast %cst_34 : f32 to vector<16x128xf32>
    %97 = arith.subf %96, %95 : vector<16x128xf32>
    %98 = math.exp %97 : vector<16x128xf32>
    %99 = math.log1p %98 : vector<16x128xf32>
    %100 = arith.addf %91, %99 : vector<16x128xf32>
    %101 = arith.select %93, %94, %100 : vector<16x128xi1>, vector<16x128xf32>
    %c2_i32_35 = arith.constant 2 : i32
    %102 = tpu.dynamic_rotate %101 by %c2_i32_35 dim 0 : vector<16x128xf32>, i32 -> vector<16x128xf32>
    %c2_i32_36 = arith.constant 2 : i32
    %103 = vector.broadcast %c2_i32_36 : i32 to vector<16x128xi32>
    %104 = arith.cmpi sge, %6, %103 : vector<16x128xi32>
    %cst_37 = arith.constant 0xFF800000 : f32
    %105 = vector.broadcast %cst_37 : f32 to vector<16x128xf32>
    %106 = arith.select %104, %102, %105 : vector<16x128xi1>, vector<16x128xf32>
    %107 = arith.maximumf %101, %106 : vector<16x128xf32>
    %108 = arith.subf %101, %106 : vector<16x128xf32>
    %109 = arith.cmpf one, %108, %108 : vector<16x128xf32>
    %110 = arith.addf %101, %106 : vector<16x128xf32>
    %111 = math.absf %108 : vector<16x128xf32>
    %cst_38 = arith.constant 0.000000e+00 : f32
    %112 = vector.broadcast %cst_38 : f32 to vector<16x128xf32>
    %113 = arith.subf %112, %111 : vector<16x128xf32>
    %114 = math.exp %113 : vector<16x128xf32>
    %115 = math.log1p %114 : vector<16x128xf32>
    %116 = arith.addf %107, %115 : vector<16x128xf32>
    %117 = arith.select %109, %110, %116 : vector<16x128xi1>, vector<16x128xf32>
    %c4_i32_39 = arith.constant 4 : i32
    %118 = tpu.dynamic_rotate %117 by %c4_i32_39 dim 0 : vector<16x128xf32>, i32 -> vector<16x128xf32>
    %c4_i32_40 = arith.constant 4 : i32
    %119 = vector.broadcast %c4_i32_40 : i32 to vector<16x128xi32>
    %120 = arith.cmpi sge, %6, %119 : vector<16x128xi32>
    %cst_41 = arith.constant 0xFF800000 : f32
    %121 = vector.broadcast %cst_41 : f32 to vector<16x128xf32>
    %122 = arith.select %120, %118, %121 : vector<16x128xi1>, vector<16x128xf32>
    %123 = arith.maximumf %117, %122 : vector<16x128xf32>
    %124 = arith.subf %117, %122 : vector<16x128xf32>
    %125 = arith.cmpf one, %124, %124 : vector<16x128xf32>
    %126 = arith.addf %117, %122 : vector<16x128xf32>
    %127 = math.absf %124 : vector<16x128xf32>
    %cst_42 = arith.constant 0.000000e+00 : f32
    %128 = vector.broadcast %cst_42 : f32 to vector<16x128xf32>
    %129 = arith.subf %128, %127 : vector<16x128xf32>
    %130 = math.exp %129 : vector<16x128xf32>
    %131 = math.log1p %130 : vector<16x128xf32>
    %132 = arith.addf %123, %131 : vector<16x128xf32>
    %133 = arith.select %125, %126, %132 : vector<16x128xi1>, vector<16x128xf32>
    %c8_i32_43 = arith.constant 8 : i32
    %134 = tpu.dynamic_rotate %133 by %c8_i32_43 dim 0 : vector<16x128xf32>, i32 -> vector<16x128xf32>
    %c8_i32_44 = arith.constant 8 : i32
    %135 = vector.broadcast %c8_i32_44 : i32 to vector<16x128xi32>
    %136 = arith.cmpi sge, %6, %135 : vector<16x128xi32>
    %cst_45 = arith.constant 0xFF800000 : f32
    %137 = vector.broadcast %cst_45 : f32 to vector<16x128xf32>
    %138 = arith.select %136, %134, %137 : vector<16x128xi1>, vector<16x128xf32>
    %139 = arith.maximumf %133, %138 : vector<16x128xf32>
    %140 = arith.subf %133, %138 : vector<16x128xf32>
    %141 = arith.cmpf one, %140, %140 : vector<16x128xf32>
    %142 = arith.addf %133, %138 : vector<16x128xf32>
    %143 = math.absf %140 : vector<16x128xf32>
    %cst_46 = arith.constant 0.000000e+00 : f32
    %144 = vector.broadcast %cst_46 : f32 to vector<16x128xf32>
    %145 = arith.subf %144, %143 : vector<16x128xf32>
    %146 = math.exp %145 : vector<16x128xf32>
    %147 = math.log1p %146 : vector<16x128xf32>
    %148 = arith.addf %139, %147 : vector<16x128xf32>
    %149 = arith.select %141, %142, %148 : vector<16x128xi1>, vector<16x128xf32>
    %150 = vector.broadcast %5 : vector<1x128xf32> to vector<16x128xf32>
    %151 = arith.maximumf %150, %149 : vector<16x128xf32>
    %152 = vector.broadcast %5 : vector<1x128xf32> to vector<16x128xf32>
    %153 = arith.subf %152, %149 : vector<16x128xf32>
    %154 = arith.cmpf one, %153, %153 : vector<16x128xf32>
    %155 = vector.broadcast %5 : vector<1x128xf32> to vector<16x128xf32>
    %156 = arith.addf %155, %149 : vector<16x128xf32>
    %157 = math.absf %153 : vector<16x128xf32>
    %cst_47 = arith.constant 0.000000e+00 : f32
    %158 = vector.broadcast %cst_47 : f32 to vector<16x128xf32>
    %159 = arith.subf %158, %157 : vector<16x128xf32>
    %160 = math.exp %159 : vector<16x128xf32>
    %161 = math.log1p %160 : vector<16x128xf32>
    %162 = arith.addf %151, %161 : vector<16x128xf32>
    %163 = arith.select %154, %156, %162 : vector<16x128xi1>, vector<16x128xf32>
    %164 = arith.addf %84, %163 : vector<16x128xf32>
    %165 = math.exp %164 : vector<16x128xf32>
    %c0_48 = arith.constant 0 : index
    %c0_49 = arith.constant 0 : index
    %c0_50 = arith.constant 0 : index
    %166 = vector.load %arg5[%c0_48, %c0_49, %c0_50] : memref<1x16x128xf32, #tpu.memory_space<vmem>>, vector<1x16x128xf32>
    %167 = vector.shape_cast %166 : vector<1x16x128xf32> to vector<16x128xf32>
    %168 = vector.shape_cast %165 : vector<16x128xf32> to vector<1x16x128xf32>
    tpu.vector_store %arg5[%c0_48, %c0_49, %c0_50], %168 {strides = array<i32>} : memref<1x16x128xf32, #tpu.memory_space<vmem>>, vector<1x16x128xf32>,
    %169 = vector.extract_strided_slice %164 {offsets = [15, 0], sizes = [1, 128], strides = [1, 1]} : vector<16x128xf32> to vector<1x128xf32>
    %c0_51 = arith.constant 0 : index
    %c0_52 = arith.constant 0 : index
    %170 = vector.load %arg6[%c0_51, %c0_52] : memref<1x128xf32, #tpu.memory_space<vmem>>, vector<1x128xf32>
    tpu.vector_store %arg6[%c0_51, %c0_52], %169 {strides = array<i32>} : memref<1x128xf32, #tpu.memory_space<vmem>>, vector<1x128xf32>,
    return
  }
  func.func @transform_0(%arg0: i32, %arg1: i32, %arg2: i32) -> (i32, i32, i32) {
    %c0_i32 = arith.constant 0 : i32
    %c0_i32_0 = arith.constant 0 : i32
    return %arg0, %arg2, %c0_i32 : i32, i32, i32
  }
  func.func @transform_1(%arg0: i32, %arg1: i32, %arg2: i32) -> (i32, i32, i32) {
    %c0_i32 = arith.constant 0 : i32
    %c0_i32_0 = arith.constant 0 : i32
    %c0_i32_1 = arith.constant 0 : i32
    return %arg1, %c0_i32, %c0_i32_0 : i32, i32, i32
  }
  func.func @transform_2(%arg0: i32, %arg1: i32, %arg2: i32) -> (i32, i32, i32) {
    %c0_i32 = arith.constant 0 : i32
    return %arg0, %arg2, %arg1 : i32, i32, i32
  }
}

</mosaic_0001>

<bundles_post_ra>
// kernel: minlstm_forward_packed.1
= control target key start
LH: loop header
LB: loop body
LE: loop exit
PB: predicated region body
PF: predicated region fallthrough
CT: control target
= control target key end

     0   :  { %s1058_s9 = smov 0   ;;  %s1060_s10 = smov 0   ;;  %s1206_s0 = inlined_call_operand.vmem [shape: bf16[2,16,32], index: 0, kind: input, shape index: {}]   ;;  %s1207_s1 = inlined_call_operand.vmem [shape: bf16[1,32,384], index: 1, kind: input, shape index: {}]   ;;  %s1208_s2 = inlined_call_operand.vmem [shape: f32[2,16,128], index: 2, kind: output, shape index: {}]  }
   0x1   :  { %s1062_s11 = smov 0  }
   0x2 LB: > { %s31_s12 = sadd.s32 1, %s1033_s10  ;;  %p871_p0 = scmp.ge.s32.totalorder %s1037_s11, 1  ;;  %s1037_s11 = sphi %s1062_s11, %s12_s11   ;;  %s1033_s10 = sphi %s1060_s10, %s1212_s10   ;;  %s1029_s9 = sphi %s1058_s9, %s1211_s9  }
   0x3   : > { %p33_p1 = scmp.ge.s32.totalorder %s31_s12, 2  ;;  %p152_p2 = scmp.lt.s32.totalorder %s1037_s11, 3 }
   0x5   : > { %s1214_s12 = smov (%p33_p1, %s31_s12), 0  ;;  %p153_p3 = pnand %p871_p0, %p152_p2 }
   0x6   : > { %v930_v0 = vld [vmem:[%s1207_s1 + $0x4] ss:$12 sps:$4 sm:$0xff] (!%p153_p3)   ;;  %v1039_v1 = vmov (!%p153_p3), 0.0   ;;  %v932_v2 = vld [vmem:[%s1207_s1 + $0x8] ss:$12 sps:$4 sm:$0xff] (!%p153_p3)   ;;  %vm1040_vm0 = vmmov (!%p153_p3), 0  }
   0x7   : > { %156 = sbr.rel (%p153_p3) target bundleno = 550 (0x226), region = 28  ;;  %894 = vmatprep.subr.bf16.mxu1 (!%p153_p3), %v1039_v1  ;;  %898 = vmatprep.mubr.msk.bf16.mxu1 (!%p153_p3), %vm1040_vm0, %v1039_v1  ;;  %v933_v3 = vld [vmem:[%s1207_s1] ss:$12 sps:$4 sm:$0xff] (!%p153_p3)   ;;  %p191_p4 = scmp.lt.s32.totalorder (!%p153_p3), %s1029_s9, 1  ;;  %v934_v4 = vld [vmem:[%s1207_s1 + $0x1c] ss:$12 sps:$4 sm:$0xff] (!%p153_p3)  }
   0x8   : > { %279 = vmatprep.subr.bf16.mxu0 (!%p153_p3), %v930_v0  ;;  %895 = vmatpush3.bf16.msra.mxu1 (!%p153_p3), %v932_v2  ;;  %v1041_v5 = vmov (!%p153_p3), 0   ;;  %v936_v6 = vld [vmem:[%s1207_s1 + $0x20] ss:$12 sps:$4 sm:$0xff] (!%p153_p3)   ;;  %v937_v7 = vld [vmem:[%s1207_s1 + $0x18] ss:$12 sps:$4 sm:$0xff] (!%p153_p3)   ;;  %vm275_vm1 = vcmask (!%p153_p3), 261120  }
   0x9   : > { %311 = vmatprep.mubr.bf16.mxu0 (!%p153_p3), %v1041_v5  ;;  %280 = vmatpush1.bf16.msra.mxu0 (!%p153_p3), %v933_v3  ;;  %v1042_v9 = vmov (!%p153_p3), -inf  }
   0xa   : > { %896 = vmatprep.subr.bf16.mxu1 (!%p153_p3), %v1039_v1  ;;  %281 = vmatprep.subr.bf16.mxu0 (!%p153_p3), %v934_v4  ;;  %223 = vst [vmem:[#allocation2] sm:$0x1] (!%p153_p3), %v1042_v9 }
   0xc   : > { %897 = vmatpush3.bf16.msra.mxu1 (!%p153_p3), %v936_v6 }
   0xd   : > { %282 = vmatpush1.bf16.msra.mxu0 (!%p153_p3), %v937_v7 }
   0xe   : > { %s1216_s9 = smov (!%p191_p4, %s1029_s9), 1 }
   0xf   : > { %s889_s25 = sshll.u32 %s1216_s9, 3  ;;  %s890_s29 = sshll.u32 %s1216_s9, 4 }
  0x10   : > { %s198_s28 = scalar_lea.vmem %s1206_s0, %s889_s25  ;;  %s216_s4 = scalar_lea.vmem %s1208_s2, %s890_s29 }
  0x11   : > { %v938_v8 = vld [vmem:[%s198_s28] sm:$0xff]  }
  0x12   : > { %899 = vmatmul.mubr.msk.bf16.vlgmr.msra.gmra.mrb[0].mxu1 %vm275_vm1, %v938_v8  ;;  %883 = vmatmul.mubr.msk.bf16.vlgmr.msra.gmra.mrb[0].mxu0 %vm275_vm1, %v938_v8 }
  0xe5   : > { %v356_v10 = vpop.f32.mrb[0].mxu1  ;;  %v1100_v12 = vpop.f32.mrb[0].mxu0 }
  0xe6   : > { %v395_v11 = vsub.f32 0.0, %v356_v10  ;;  %v900_v13 = vpop.f32.mrb[1].mxu1  ;;  %v315_v14 = vpop.f32.mrb[1].mxu0  ;;  %v463_v50 = vmul.f32 0.5, %v1100_v12  ;;  %vm471_vm6 = vcmp.ge.f32.partialorder %v1100_v12, 0.0 }
  0xe7   : > { %v1102_v15 = vpop.f32.mrb[2].mxu1  ;;  %v363_v17 = vsub.f32 0.0, %v315_v14  ;;  %v1105_v19 = vpop.f32.mrb[2].mxu0 }
  0xe8   : > { %v399_v16 = vand.u32 2147483647, %v395_v11  ;;  %v396_v18 = vsub.f32 0.0, %v1102_v15  ;;  %v901_v20 = vpop.f32.mrb[3].mxu1  ;;  %v1107_v21 = vpop.f32.mrb[3].mxu0  ;;  %v397_v52 = vmax.f32 %v395_v11, 0.0 }
  0xe9   : > { %v367_v23 = vand.u32 2147483647, %v363_v17  ;;  %v364_v25 = vsub.f32 0.0, %v1107_v21  ;;  %v365_v58 = vmax.f32 %v363_v17, 0.0  ;;  %v464_v60 = vmul.f32 0.5, %v1105_v19 }
  0xea   : > { %v401_v22 = vsub.f32 0.0, %v399_v16  ;;  %v400_v24 = vand.u32 2147483647, %v396_v18  ;;  %v398_v9 = vmax.f32 %v396_v18, 0.0  ;;  %vm472_vm7 = vcmp.ge.f32.partialorder %v1105_v19, 0.0 }
  0xeb   : > { %v369_v27 = vsub.f32 0.0, %v367_v23  ;;  %v368_v29 = vand.u32 2147483647, %v364_v25  ;;  %v366_v16 = vmax.f32 %v364_v25, 0.0 }
  0xec   : > { %v403_v26 = vmul.f32 1.442695, %v401_v22  ;;  %v402_v28 = vsub.f32 0.0, %v400_v24 }
  0xed   : > { %v371_v30 = vmul.f32 1.442695, %v369_v27  ;;  %v370_v32 = vsub.f32 0.0, %v368_v29 }
  0xee   : > { %939 = vpow2.f32 %v403_v26  ;;  %v405_v31 = vmul.f32 1.442695, %v402_v28 }
  0xef   : > { %941 = vpow2.f32 %v371_v30  ;;  %v373_v33 = vmul.f32 1.442695, %v370_v32 }
  0xf0   : > { %943 = vpow2.f32 %v405_v31 }
  0xf1   : > { %945 = vpow2.f32 %v373_v33 }
  0xf8   : > { %v940_v34 = vpop.eup %939 }
  0xf9   : > { %v407_v35 = vadd.f32 1.0, %v940_v34  ;;  %v942_v36 = vpop.eup %941  ;;  %v410_v41 = vmul.f32 -0.5, %v940_v34  ;;  %v413_v46 = vand.u32 2147483647, %v940_v34 }
  0xfa   : > { %v944_v37 = vpop.eup %943  ;;  %v375_v38 = vadd.f32 1.0, %v942_v36  ;;  %v378_v43 = vmul.f32 -0.5, %v942_v36  ;;  %v381_v51 = vand.u32 2147483647, %v942_v36 }
  0xfb   : > { %947 = vlog2.f32 %v407_v35  ;;  %v416_v39 = vadd.f32 1.0, %v944_v37  ;;  %v946_v40 = vpop.eup %945  ;;  %v411_v44 = vadd.f32 1.0, %v410_v41  ;;  %v419_v45 = vmul.f32 -0.5, %v944_v37 }
  0xfc   : > { %949 = vlog2.f32 %v375_v38  ;;  %v384_v42 = vadd.f32 1.0, %v946_v40  ;;  %v379_v47 = vadd.f32 1.0, %v378_v43  ;;  %v387_v48 = vmul.f32 -0.5, %v946_v40 }
  0xfd   : > { %951 = vlog2.f32 %v416_v39  ;;  %v412_v54 = vmul.f32 %v940_v34, %v411_v44  ;;  %v420_v55 = vadd.f32 1.0, %v419_v45  ;;  %vm1115_vm2 = vcmp.lt.f32.partialorder %v413_v46, 0.0004427343 }
  0xfe   : > { %953 = vlog2.f32 %v384_v42  ;;  %v422_v59 = vand.u32 2147483647, %v944_v37  ;;  %v380_v0 = vmul.f32 %v942_v36, %v379_v47  ;;  %v388_v1 = vadd.f32 1.0, %v387_v48 }
  0xff   : > { %955 = vtanh.f32 %v463_v50  ;;  %vm382_vm3 = vcmp.lt.f32.partialorder %v381_v51, 0.0004427343  ;;  %v390_v3 = vand.u32 2147483647, %v946_v40  ;;  %v421_v5 = vmul.f32 %v944_v37, %v420_v55 }
 0x100   : > { %vm423_vm4 = vcmp.lt.f32.partialorder %v422_v59, 0.0004427343  ;;  %v389_v13 = vmul.f32 %v946_v40, %v388_v1  ;;  %957 = vtanh.f32 %v464_v60  ;;  %v473_v35 = vadd.f32 0.5, %v1100_v12 }
 0x101   : > { %vm391_vm5 = vcmp.lt.f32.partialorder %v390_v3, 0.0004427343  ;;  %v474_v40 = vadd.f32 0.5, %v1105_v19 }
 0x105   : > { %v948_v49 = vpop.eup %947 }
 0x106   : > { %v409_v53 = vmul.f32 0.6931472, %v948_v49  ;;  %v950_v56 = vpop.eup %949 }
 0x107   : > { %v952_v61 = vpop.eup %951  ;;  %v377_v63 = vmul.f32 0.6931472, %v950_v56 }
 0x108   : > { %v415_v62 = vsel %vm1115_vm2, %v412_v54, %v409_v53  ;;  %v418_v2 = vmul.f32 0.6931472, %v952_v61  ;;  %v954_v6 = vpop.eup %953  ;;  %v233_v54 = vlaneseq }
 0x109   : > { %v383_v4 = vsel %vm382_vm3, %v380_v0, %v377_v63  ;;  %v425_v7 = vadd.f32 %v415_v62, %v397_v52  ;;  %v386_v11 = vmul.f32 0.6931472, %v954_v6  ;;  %v956_v15 = vpop.eup %955 }
 0x10a   : > { %v393_v8 = vadd.f32 %v383_v4, %v365_v58  ;;  %v424_v10 = vsel %vm423_vm4, %v421_v5, %v418_v2  ;;  %v467_v29 = vmul.f32 0.5, %v956_v15  ;;  %v958_v30 = vpop.eup %957  ;;  %v1139_v62 = vshrl.u32 %v233_v54, 7 }
 0x10b   : > { %v392_v17 = vsel %vm391_vm5, %v389_v13, %v386_v11  ;;  %v426_v22 = vadd.f32 %v424_v10, %v398_v9  ;;  %v468_v25 = vmul.f32 0.5, %v958_v30 }
 0x10c   : > { %v1124_v14 = vsub.f32 %v393_v8, %v425_v7  ;;  %v394_v23 = vadd.f32 %v392_v17, %v366_v16  ;;  %v469_v21 = vadd.f32 0.5, %v467_v29  ;;  %vm487_vm10 = vcmp.lt.s32.totalorder %v1139_v62, 1 }
 0x10d   : > { %v470_v33 = vadd.f32 0.5, %v468_v25  ;;  %vm490_vm11 = vcmp.ge.s32.totalorder %v1139_v62, 1  ;;  %vm498_vm12 = vcmp.lt.s32.totalorder %v1139_v62, 2  ;;  %vm501_vm13 = vcmp.ge.s32.totalorder %v1139_v62, 2 }
 0x10e   : > { %v431_v20 = vand.u32 2147483647, %v1124_v14  ;;  %v1129_v26 = vsub.f32 %v394_v23, %v426_v22  ;;  %v475_v32 = vmax.f32 %v469_v21, 1e-38  ;;  %v429_v50 = vmax.f32 %v1124_v14, 0.0 }
 0x10f   : > { %v476_v38 = vmax.f32 %v470_v33, 1e-38  ;;  %vm509_vm14 = vcmp.lt.s32.totalorder %v1139_v62, 4  ;;  %vm512_vm15 = vcmp.ge.s32.totalorder %v1139_v62, 4 }
 0x110   : > { %v433_v24 = vsub.f32 0.0, %v431_v20  ;;  %v432_v27 = vand.u32 2147483647, %v1129_v26  ;;  %v477_v37 = vsel %vm471_vm6, %v473_v35, %v475_v32  ;;  %v430_v60 = vmax.f32 %v1129_v26, 0.0 }
 0x111   : > { %v478_v43 = vsel %vm472_vm7, %v474_v40, %v476_v38 }
 0x112   : > { %v435_v18 = vmul.f32 1.442695, %v433_v24  ;;  %v434_v28 = vsub.f32 0.0, %v432_v27 }
 0x114   : > { %959 = vpow2.f32 %v435_v18  ;;  %v437_v31 = vmul.f32 1.442695, %v434_v28 }
 0x116   : > { %961 = vpow2.f32 %v437_v31 }
 0x11e   : > { %v960_v34 = vpop.eup %959 }
 0x11f   : > { %v439_v36 = vadd.f32 1.0, %v960_v34  ;;  %v442_v42 = vmul.f32 -0.5, %v960_v34  ;;  %v445_v46 = vand.u32 2147483647, %v960_v34 }
 0x120   : > { %v962_v39 = vpop.eup %961 }
 0x121   : > { %963 = vlog2.f32 %v439_v36  ;;  %v448_v41 = vadd.f32 1.0, %v962_v39  ;;  %v443_v44 = vadd.f32 1.0, %v442_v42  ;;  %v451_v45 = vmul.f32 -0.5, %v962_v39 }
 0x122   : > { %965 = vlog2.f32 %v477_v37  ;;  %vm446_vm8 = vcmp.lt.f32.partialorder %v445_v46, 0.0004427343  ;;  %v454_v51 = vand.u32 2147483647, %v962_v39 }
 0x123   : > { %967 = vlog2.f32 %v448_v41  ;;  %v444_v12 = vmul.f32 %v960_v34, %v443_v44  ;;  %v452_v49 = vadd.f32 1.0, %v451_v45 }
 0x124   : > { %969 = vlog2.f32 %v478_v43  ;;  %vm455_vm9 = vcmp.lt.f32.partialorder %v454_v51, 0.0004427343 }
 0x125   : > { %v453_v57 = vmul.f32 %v962_v39, %v452_v49 }
 0x12b   : > { %v964_v47 = vpop.eup %963 }
 0x12c   : > { %v441_v48 = vmul.f32 0.6931472, %v964_v47  ;;  %v966_v52 = vpop.eup %965 }
 0x12d   : > { %v968_v55 = vpop.eup %967  ;;  %v480_v58 = vmul.f32 0.6931472, %v966_v52 }
 0x12e   : > { %v447_v53 = vsel %vm446_vm8, %v444_v12, %v441_v48  ;;  %v450_v19 = vmul.f32 0.6931472, %v968_v55  ;;  %v970_v61 = vpop.eup %969 }
 0x12f   : > { %v457_v56 = vadd.f32 %v447_v53, %v429_v50  ;;  %v482_v3 = vmul.f32 0.6931472, %v970_v61 }
 0x130   : > { %v456_v63 = vsel %vm455_vm9, %v453_v57, %v450_v19 }
 0x131   : > { %v461_v59 = vsub.f32 %v1124_v14, %v457_v56  ;;  %v459_v0 = vsub.f32 0.0, %v457_v56  ;;  %v458_v2 = vadd.f32 %v456_v63, %v430_v60 }
 0x133   : > { %v483_v1 = vadd.f32 %v480_v58, %v461_v59  ;;  %v460_v4 = vsub.f32 0.0, %v458_v2  ;;  %v462_v5 = vsub.f32 %v1129_v26, %v458_v2  ;;  %v485_v6 = vrot.slane %v459_v0, 7 }
 0x135   : > { %v484_v7 = vadd.f32 %v482_v3, %v462_v5  ;;  %v486_v8 = vrot.slane %v460_v4, 7 }
 0x137   : > { %v488_v9 = vsel %vm487_vm10, %v485_v6, %v486_v8  ;;  %v489_v10 = vsel %vm487_vm10, %v486_v8, %v485_v6 }
 0x138   : > { %v492_v11 = vsel %vm490_vm11, %v489_v10, 0.0  ;;  %v495_v13 = vadd.f32 %v488_v9, %v460_v4 }
 0x139   : > { %v494_v14 = vadd.f32 %v492_v11, %v459_v0 }
 0x13a   : > { %v497_v16 = vrot.slane %v495_v13, 6 }
 0x13b   : > { %v496_v17 = vrot.slane %v494_v14, 6 }
 0x13d   : > { %v499_v20 = vsel %vm498_vm12, %v496_v17, %v497_v16  ;;  %v500_v22 = vsel %vm498_vm12, %v497_v16, %v496_v17 }
 0x13e   : > { %v503_v23 = vsel %vm501_vm13, %v500_v22, 0.0  ;;  %v506_v24 = vadd.f32 %v499_v20, %v495_v13 }
 0x13f   : > { %v505_v26 = vadd.f32 %v503_v23, %v494_v14 }
 0x140   : > { %v508_v15 = vrot.slane %v506_v24, 4 }
 0x141   : > { %v507_v18 = vrot.slane %v505_v26, 4 }
 0x143   : > { %v510_v27 = vsel %vm509_vm14, %v507_v18, %v508_v15  ;;  %v511_v28 = vsel %vm509_vm14, %v508_v15, %v507_v18 }
 0x144   : > { %v514_v29 = vsel %vm512_vm15, %v511_v28, 0.0  ;;  %v517_v30 = vadd.f32 %v510_v27, %v506_v24 }
 0x145   : > { %v1166_v31 = vadd.f32 %v514_v29, %v505_v26 }
 0x147   : > { %v1169_v21 = vadd.f32 %v517_v30, %v1166_v31  ;;  %v524_v25 = vsub.f32 %v483_v1, %v1166_v31 }
 0x149   : > { %v525_v32 = vsub.f32 %v484_v7, %v1169_v21  ;;  %v526_v33 = vrot.slane %v524_v25, 7 }
 0x14b   : > { %v527_v34 = vrot.slane %v525_v32, 7 }
 0x14d   : > { %v528_v35 = vsel %vm487_vm10, %v526_v33, %v527_v34  ;;  %v529_v36 = vsel %vm487_vm10, %v527_v34, %v526_v33 }
 0x14e   : > { %v530_v37 = vsel %vm490_vm11, %v529_v36, -inf  ;;  %v533_v38 = vmax.f32 %v525_v32, %v528_v35  ;;  %v535_v39 = vsub.f32 %v525_v32, %v528_v35  ;;  %v539_v40 = vadd.f32 %v528_v35, %v525_v32 }
 0x14f   : > { %v532_v41 = vmax.f32 %v524_v25, %v530_v37  ;;  %v534_v42 = vsub.f32 %v524_v25, %v530_v37  ;;  %v538_v43 = vadd.f32 %v530_v37, %v524_v25 }
 0x150   : > { %v541_v44 = vand.u32 2147483647, %v535_v39  ;;  %vm537_vm2 = vcmp.ne.f32.partialorder %v535_v39, %v535_v39 }
 0x151   : > { %v540_v45 = vand.u32 2147483647, %v534_v42  ;;  %vm536_vm3 = vcmp.ne.f32.partialorder %v534_v42, %v534_v42 }
 0x152   : > { %v543_v46 = vsub.f32 0.0, %v541_v44 }
 0x153   : > { %v542_v47 = vsub.f32 0.0, %v540_v45 }
 0x154   : > { %v546_v48 = vmul.f32 1.442695, %v543_v46 }
 0x155   : > { %v544_v12 = vmul.f32 1.442695, %v542_v47 }
 0x156   : > { %971 = vpow2.f32 %v546_v48 }
 0x157   : > { %973 = vpow2.f32 %v544_v12 }
 0x160   : > { %v972_v49 = vpop.eup %971 }
 0x161   : > { %v974_v50 = vpop.eup %973  ;;  %v557_v51 = vadd.f32 1.0, %v972_v49  ;;  %v560_v53 = vmul.f32 -0.5, %v972_v49  ;;  %v563_v19 = vand.u32 2147483647, %v972_v49 }
 0x162   : > { %v548_v52 = vadd.f32 1.0, %v974_v50  ;;  %v551_v54 = vmul.f32 -0.5, %v974_v50  ;;  %v554_v57 = vand.u32 2147483647, %v974_v50 }
 0x163   : > { %975 = vlog2.f32 %v557_v51  ;;  %v561_v55 = vadd.f32 1.0, %v560_v53  ;;  %vm564_vm0 = vcmp.lt.f32.partialorder %v563_v19, 0.0004427343 }
 0x164   : > { %977 = vlog2.f32 %v548_v52  ;;  %v552_v56 = vadd.f32 1.0, %v551_v54  ;;  %vm555_vm1 = vcmp.lt.f32.partialorder %v554_v57, 0.0004427343 }
 0x165   : > { %v562_v61 = vmul.f32 %v972_v49, %v561_v55 }
 0x166   : > { %v553_v0 = vmul.f32 %v974_v50, %v552_v56 }
 0x16d   : > { %v976_v58 = vpop.eup %975 }
 0x16e   : > { %v978_v59 = vpop.eup %977  ;;  %v559_v60 = vmul.f32 0.6931472, %v976_v58 }
 0x16f   : > { %v550_v63 = vmul.f32 0.6931472, %v978_v59 }
 0x170   : > { %v565_v1 = vsel %vm564_vm0, %v562_v61, %v559_v60 }
 0x171   : > { %v556_v2 = vsel %vm555_vm1, %v553_v0, %v550_v63  ;;  %v567_v3 = vadd.f32 %v565_v1, %v533_v38 }
 0x172   : > { %v566_v4 = vadd.f32 %v556_v2, %v532_v41 }
 0x173   : > { %v569_v5 = vsel %vm537_vm2, %v539_v40, %v567_v3 }
 0x174   : > { %v568_v6 = vsel %vm536_vm3, %v538_v43, %v566_v4  ;;  %v571_v7 = vrot.slane %v569_v5, 6 }
 0x175   : > { %v570_v8 = vrot.slane %v568_v6, 6 }
 0x177   : > { %v572_v9 = vsel %vm498_vm12, %v570_v8, %v571_v7  ;;  %v573_v10 = vsel %vm498_vm12, %v571_v7, %v570_v8 }
 0x178   : > { %v574_v11 = vsel %vm501_vm13, %v573_v10, -inf  ;;  %v577_v13 = vmax.f32 %v569_v5, %v572_v9  ;;  %v579_v14 = vsub.f32 %v569_v5, %v572_v9  ;;  %v583_v16 = vadd.f32 %v572_v9, %v569_v5 }
 0x179   : > { %v576_v17 = vmax.f32 %v568_v6, %v574_v11  ;;  %v578_v20 = vsub.f32 %v568_v6, %v574_v11  ;;  %v582_v22 = vadd.f32 %v574_v11, %v568_v6 }
 0x17a   : > { %v585_v23 = vand.u32 2147483647, %v579_v14  ;;  %vm581_vm6 = vcmp.ne.f32.partialorder %v579_v14, %v579_v14 }
 0x17b   : > { %v584_v24 = vand.u32 2147483647, %v578_v20  ;;  %vm580_vm7 = vcmp.ne.f32.partialorder %v578_v20, %v578_v20 }
 0x17c   : > { %v587_v26 = vsub.f32 0.0, %v585_v23 }
 0x17d   : > { %v586_v15 = vsub.f32 0.0, %v584_v24 }
 0x17e   : > { %v590_v18 = vmul.f32 1.442695, %v587_v26 }
 0x17f   : > { %v588_v27 = vmul.f32 1.442695, %v586_v15 }
 0x180   : > { %979 = vpow2.f32 %v590_v18 }
 0x181   : > { %981 = vpow2.f32 %v588_v27 }
 0x18a   : > { %v980_v28 = vpop.eup %979 }
 0x18b   : > { %v982_v29 = vpop.eup %981  ;;  %v601_v30 = vadd.f32 1.0, %v980_v28  ;;  %v604_v32 = vmul.f32 -0.5, %v980_v28  ;;  %v607_v36 = vand.u32 2147483647, %v980_v28 }
 0x18c   : > { %v592_v25 = vadd.f32 1.0, %v982_v29  ;;  %v595_v33 = vmul.f32 -0.5, %v982_v29  ;;  %v598_v37 = vand.u32 2147483647, %v982_v29 }
 0x18d   : > { %983 = vlog2.f32 %v601_v30  ;;  %v605_v34 = vadd.f32 1.0, %v604_v32  ;;  %vm608_vm4 = vcmp.lt.f32.partialorder %v607_v36, 0.0004427343 }
 0x18e   : > { %985 = vlog2.f32 %v592_v25  ;;  %v596_v35 = vadd.f32 1.0, %v595_v33  ;;  %vm599_vm5 = vcmp.lt.f32.partialorder %v598_v37, 0.0004427343 }
 0x18f   : > { %v606_v41 = vmul.f32 %v980_v28, %v605_v34 }
 0x190   : > { %v597_v43 = vmul.f32 %v982_v29, %v596_v35 }
 0x197   : > { %v984_v38 = vpop.eup %983 }
 0x198   : > { %v986_v39 = vpop.eup %985  ;;  %v603_v40 = vmul.f32 0.6931472, %v984_v38 }
 0x199   : > { %v594_v42 = vmul.f32 0.6931472, %v986_v39 }
 0x19a   : > { %v609_v44 = vsel %vm608_vm4, %v606_v41, %v603_v40 }
 0x19b   : > { %v600_v45 = vsel %vm599_vm5, %v597_v43, %v594_v42  ;;  %v611_v46 = vadd.f32 %v609_v44, %v577_v13 }
 0x19c   : > { %v610_v47 = vadd.f32 %v600_v45, %v576_v17 }
 0x19d   : > { %v613_v48 = vsel %vm581_vm6, %v583_v16, %v611_v46 }
 0x19e   : > { %v612_v12 = vsel %vm580_vm7, %v582_v22, %v610_v47  ;;  %v615_v49 = vrot.slane %v613_v48, 4 }
 0x19f   : > { %v614_v50 = vrot.slane %v612_v12, 4 }
 0x1a1   : > { %v616_v51 = vsel %vm509_vm14, %v614_v50, %v615_v49  ;;  %v617_v52 = vsel %vm509_vm14, %v615_v49, %v614_v50 }
 0x1a2   : > { %v618_v53 = vsel %vm512_vm15, %v617_v52, -inf  ;;  %v621_v54 = vmax.f32 %v613_v48, %v616_v51  ;;  %v623_v55 = vsub.f32 %v613_v48, %v616_v51  ;;  %v627_v56 = vadd.f32 %v616_v51, %v613_v48 }
 0x1a3   : > { %v620_v19 = vmax.f32 %v612_v12, %v618_v53  ;;  %v622_v57 = vsub.f32 %v612_v12, %v618_v53  ;;  %v626_v58 = vadd.f32 %v618_v53, %v612_v12  ;;  %v886_v53 = vld [vmem:[#allocation2] ss:$0 sm:$0xff] }
 0x1a4   : > { %v629_v59 = vand.u32 2147483647, %v623_v55  ;;  %vm625_vm10 = vcmp.ne.f32.partialorder %v623_v55, %v623_v55 }
 0x1a5   : > { %v628_v60 = vand.u32 2147483647, %v622_v57  ;;  %vm624_vm11 = vcmp.ne.f32.partialorder %v622_v57, %v622_v57 }
 0x1a6   : > { %v631_v61 = vsub.f32 0.0, %v629_v59 }
 0x1a7   : > { %v630_v63 = vsub.f32 0.0, %v628_v60 }
 0x1a8   : > { %v634_v0 = vmul.f32 1.442695, %v631_v61 }
 0x1a9   : > { %v632_v1 = vmul.f32 1.442695, %v630_v63 }
 0x1aa   : > { %987 = vpow2.f32 %v634_v0 }
 0x1ab   : > { %989 = vpow2.f32 %v632_v1 }
 0x1b4   : > { %v988_v2 = vpop.eup %987 }
 0x1b5   : > { %v990_v3 = vpop.eup %989  ;;  %v645_v4 = vadd.f32 1.0, %v988_v2  ;;  %v648_v62 = vmul.f32 -0.5, %v988_v2  ;;  %v651_v9 = vand.u32 2147483647, %v988_v2 }
 0x1b6   : > { %v636_v5 = vadd.f32 1.0, %v990_v3  ;;  %v639_v6 = vmul.f32 -0.5, %v990_v3  ;;  %v642_v10 = vand.u32 2147483647, %v990_v3 }
 0x1b7   : > { %991 = vlog2.f32 %v645_v4  ;;  %v649_v7 = vadd.f32 1.0, %v648_v62  ;;  %vm652_vm8 = vcmp.lt.f32.partialorder %v651_v9, 0.0004427343 }
 0x1b8   : > { %993 = vlog2.f32 %v636_v5  ;;  %v640_v8 = vadd.f32 1.0, %v639_v6  ;;  %vm643_vm9 = vcmp.lt.f32.partialorder %v642_v10, 0.0004427343 }
 0x1b9   : > { %v650_v16 = vmul.f32 %v988_v2, %v649_v7 }
 0x1ba   : > { %v641_v20 = vmul.f32 %v990_v3, %v640_v8 }
 0x1c1   : > { %v992_v11 = vpop.eup %991 }
 0x1c2   : > { %v994_v13 = vpop.eup %993  ;;  %v647_v14 = vmul.f32 0.6931472, %v992_v11 }
 0x1c3   : > { %v638_v17 = vmul.f32 0.6931472, %v994_v13 }
 0x1c4   : > { %v653_v22 = vsel %vm652_vm8, %v650_v16, %v647_v14 }
 0x1c5   : > { %v644_v23 = vsel %vm643_vm9, %v641_v20, %v638_v17  ;;  %v655_v24 = vadd.f32 %v653_v22, %v621_v54 }
 0x1c6   : > { %v654_v26 = vadd.f32 %v644_v23, %v620_v19 }
 0x1c7   : > { %v657_v15 = vsel %vm625_vm10, %v627_v56, %v655_v24 }
 0x1c8   : > { %v656_v18 = vsel %vm624_vm11, %v626_v58, %v654_v26 }
 0x1c9   : > { %v661_v27 = vmax.f32 %v657_v15, %v656_v18  ;;  %v885_v28 = vadd.f32 inf, %v656_v18  ;;  %v663_v29 = vsub.f32 %v657_v15, %v656_v18  ;;  %v667_v30 = vadd.f32 %v657_v15, %v656_v18 }
 0x1ca   : > { %v666_v54 = vadd.f32 -inf, %v656_v18 }
 0x1cb   : > { %v668_v25 = vand.u32 2147483647, %v885_v28  ;;  %v669_v32 = vand.u32 2147483647, %v663_v29  ;;  %vm664_vm14 = vcmp.ne.f32.partialorder %v885_v28, %v885_v28  ;;  %vm665_vm15 = vcmp.ne.f32.partialorder %v663_v29, %v663_v29 }
 0x1cd   : > { %v670_v33 = vsub.f32 0.0, %v668_v25  ;;  %v671_v34 = vsub.f32 0.0, %v669_v32 }
 0x1cf   : > { %v672_v35 = vmul.f32 1.442695, %v670_v33  ;;  %v674_v36 = vmul.f32 1.442695, %v671_v34 }
 0x1d1   : > { %995 = vpow2.f32 %v672_v35 }
 0x1d2   : > { %997 = vpow2.f32 %v674_v36 }
 0x1db   : > { %v996_v37 = vpop.eup %995 }
 0x1dc   : > { %v998_v38 = vpop.eup %997  ;;  %v676_v39 = vadd.f32 1.0, %v996_v37  ;;  %v679_v41 = vmul.f32 -0.5, %v996_v37  ;;  %v682_v44 = vand.u32 2147483647, %v996_v37 }
 0x1dd   : > { %v685_v40 = vadd.f32 1.0, %v998_v38  ;;  %v688_v42 = vmul.f32 -0.5, %v998_v38  ;;  %v691_v46 = vand.u32 2147483647, %v998_v38 }
 0x1de   : > { %999 = vlog2.f32 %v676_v39  ;;  %v680_v43 = vadd.f32 1.0, %v679_v41  ;;  %vm683_vm12 = vcmp.lt.f32.partialorder %v682_v44, 0.0004427343 }
 0x1df   : > { %1001 = vlog2.f32 %v685_v40  ;;  %v689_v45 = vadd.f32 1.0, %v688_v42  ;;  %vm692_vm13 = vcmp.lt.f32.partialorder %v691_v46, 0.0004427343 }
 0x1e0   : > { %v681_v49 = vmul.f32 %v996_v37, %v680_v43 }
 0x1e1   : > { %v690_v51 = vmul.f32 %v998_v38, %v689_v45 }
 0x1e8   : > { %v1000_v47 = vpop.eup %999 }
 0x1e9   : > { %v1002_v48 = vpop.eup %1001  ;;  %v678_v12 = vmul.f32 0.6931472, %v1000_v47 }
 0x1ea   : > { %v687_v50 = vmul.f32 0.6931472, %v1002_v48 }
 0x1eb   : > { %v684_v52 = vsel %vm683_vm12, %v681_v49, %v678_v12 }
 0x1ec   : > { %v693_v55 = vsel %vm692_vm13, %v690_v51, %v687_v50  ;;  %v694_v56 = vadd.f32 %v684_v52, %v656_v18 }
 0x1ed   : > { %v695_v19 = vadd.f32 %v693_v55, %v661_v27 }
 0x1ee   : > { %v696_v57 = vsel %vm664_vm14, %v666_v54, %v694_v56 }
 0x1ef   : > { %v697_v58 = vsel %vm665_vm15, %v667_v30, %v695_v19  ;;  %v706_v59 = vsub.f32 %v886_v53, %v696_v57  ;;  %v704_v22 = vmax.f32 %v886_v53, %v696_v57  ;;  %v710_v18 = vadd.f32 %v886_v53, %v696_v57 }
 0x1f0   : > { %v707_v60 = vsub.f32 %v886_v53, %v697_v58  ;;  %v705_v26 = vmax.f32 %v886_v53, %v697_v58  ;;  %v711_v29 = vadd.f32 %v886_v53, %v697_v58 }
 0x1f1   : > { %v712_v61 = vand.u32 2147483647, %v706_v59  ;;  %vm708_vm2 = vcmp.ne.f32.partialorder %v706_v59, %v706_v59 }
 0x1f2   : > { %v713_v63 = vand.u32 2147483647, %v707_v60  ;;  %vm709_vm3 = vcmp.ne.f32.partialorder %v707_v60, %v707_v60 }
 0x1f3   : > { %v714_v0 = vsub.f32 0.0, %v712_v61 }
 0x1f4   : > { %v715_v1 = vsub.f32 0.0, %v713_v63 }
 0x1f5   : > { %v716_v2 = vmul.f32 1.442695, %v714_v0 }
 0x1f6   : > { %v718_v3 = vmul.f32 1.442695, %v715_v1 }
 0x1f7   : > { %1003 = vpow2.f32 %v716_v2 }
 0x1f8   : > { %1005 = vpow2.f32 %v718_v3 }
 0x201   : > { %v1004_v4 = vpop.eup %1003 }
 0x202   : > { %v1006_v5 = vpop.eup %1005  ;;  %v720_v62 = vadd.f32 1.0, %v1004_v4  ;;  %v723_v7 = vmul.f32 -0.5, %v1004_v4  ;;  %v726_v10 = vand.u32 2147483647, %v1004_v4 }
 0x203   : > { %v729_v6 = vadd.f32 1.0, %v1006_v5  ;;  %v732_v8 = vmul.f32 -0.5, %v1006_v5  ;;  %v735_v13 = vand.u32 2147483647, %v1006_v5 }
 0x204   : > { %1007 = vlog2.f32 %v720_v62  ;;  %v724_v9 = vadd.f32 1.0, %v723_v7  ;;  %vm727_vm0 = vcmp.lt.f32.partialorder %v726_v10, 0.0004427343 }
 0x205   : > { %1009 = vlog2.f32 %v729_v6  ;;  %v733_v11 = vadd.f32 1.0, %v732_v8  ;;  %vm736_vm1 = vcmp.lt.f32.partialorder %v735_v13, 0.0004427343 }
 0x206   : > { %v725_v20 = vmul.f32 %v1004_v4, %v724_v9 }
 0x207   : > { %v734_v24 = vmul.f32 %v1006_v5, %v733_v11 }
 0x20e   : > { %v1008_v14 = vpop.eup %1007 }
 0x20f   : > { %v1010_v16 = vpop.eup %1009  ;;  %v722_v17 = vmul.f32 0.6931472, %v1008_v14 }
 0x210   : > { %v731_v23 = vmul.f32 0.6931472, %v1010_v16 }
 0x211   : > { %v728_v15 = vsel %vm727_vm0, %v725_v20, %v722_v17 }
 0x212   : > { %v737_v27 = vsel %vm736_vm1, %v734_v24, %v731_v23  ;;  %v738_v28 = vadd.f32 %v728_v15, %v704_v22 }
 0x213   : > { %v739_v30 = vadd.f32 %v737_v27, %v705_v26 }
 0x214   : > { %v740_v25 = vsel %vm708_vm2, %v710_v18, %v738_v28 }
 0x215   : > { %v741_v32 = vsel %vm709_vm3, %v711_v29, %v739_v30  ;;  %v742_v33 = vadd.f32 %v740_v25, %v1166_v31 }
 0x216   : > { %v743_v34 = vadd.f32 %v741_v32, %v1169_v21 }
 0x217   : > { %v744_v35 = vmul.f32 1.442695, %v742_v33 }
 0x218   : > { %v746_v36 = vmul.f32 1.442695, %v743_v34  ;;  %750 = vst [vmem:[#allocation2 - $0x7] sm:$0x80] %v743_v34 }
 0x219   : > { %1011 = vpow2.f32 %v744_v35 }
 0x21a   : > { %1013 = vpow2.f32 %v746_v36 }
 0x223   : > { %v1012_v37 = vpop.eup %1011 }
 0x224   : > { %v1014_v38 = vpop.eup %1013  ;;  %748 = vst [vmem:[%s216_s4] sm:$0xff] %v1012_v37 }
 0x225   : > { %749 = vst [vmem:[%s216_s4 + $0x8] sm:$0xff] %v1014_v38 }
 0x226 PF: > { %s12_s11 = sadd.s32 1, %s1037_s11   ;;  %s1211_s9 = smov %s1033_s10 }
 0x227   : > { %p9_p5 = scmp.ge.s32.totalorder %s12_s11, 4   ;;  %s1212_s10 = smov %s1214_s12 }
 0x229   :  { %11 = sbr.rel (!%p9_p5) target bundleno = 2 (0x2), region = 65 }

</bundles_post_ra>
